<compile_context>
chip_gen: v7x
topology: tpu7x:2x2x1
jax: 0.10.0
libtpu: 0.0.40
codegen_flags: <defaults>
</compile_context>

<pallas_src>
import numpy as np
import jax
import jax.numpy as jnp
from jax.experimental import pallas as pl
from jax.experimental.pallas import tpu as pltpu


def _hann_periodic(win_length):
    # torch.hann_window(win_length) default periodic=True
    n = np.arange(win_length, dtype=np.float64)
    return 0.5 - 0.5 * np.cos(2.0 * np.pi * n / win_length)


def _make_windowed_dft(fft_size, win_length, nb_pad):
    """Windowed real-DFT matrices, zero-padded to nb_pad frequency columns, so
    frames @ Wcos = Re(rfft(frames*win)), frames @ Wsin = Im(rfft(frames*win))."""
    win = _hann_periodic(win_length)
    left = (fft_size - win_length) // 2
    right = fft_size - win_length - left
    win_pad = np.pad(win, (left, right))          # torch.stft centers the window
    n_bins = fft_size // 2 + 1                    # onesided
    n = np.arange(fft_size, dtype=np.float64)[:, None]
    k = np.arange(n_bins, dtype=np.float64)[None, :]
    ang = 2.0 * np.pi * n * k / fft_size
    wcos = win_pad[:, None] * np.cos(ang)
    wsin = -win_pad[:, None] * np.sin(ang)
    pad_cols = nb_pad - n_bins
    wcos = np.pad(wcos, ((0, 0), (0, pad_cols)))  # extra columns are exactly zero
    wsin = np.pad(wsin, ((0, 0), (0, pad_cols)))
    w = np.concatenate([wcos, wsin], axis=1)      # (fft, 2*nb_pad)
    return jnp.asarray(w, jnp.float32)


def _frame(x, fft_size, hop):
    """torch.stft(center=True, pad_mode='reflect') framing: (B,T)->(B,n_frames,fft)."""
    pad = fft_size // 2
    xp = jnp.pad(x, ((0, 0), (pad, pad)), mode="reflect")
    n_frames = 1 + (xp.shape[1] - fft_size) // hop
    idx = jnp.arange(n_frames)[:, None] * hop + jnp.arange(fft_size)[None, :]
    return xp[:, idx]                             # (B, n_frames, fft_size)


def _stft_loss_kernel(fxy_ref, w_ref, out_ref, acc_ref):
    """Per grid step: one fused DFT matmul + magnitudes + element-wise VMEM
    accumulation.  Epilogue (last step) reduces and writes SMEM out_ref (3,):
      [0] = sum (y_mag - x_mag)^2        (SC numerator^2)
      [1] = sum clamp(y_mag^2, 1e-7)     (SC denominator^2, incl. pad clamp)
      [2] = sum |log y_mag - log x_mag|  (L1 log-magnitude sum)
    """
    i = pl.program_id(0)
    tm = acc_ref.shape[1]
    nb = acc_ref.shape[2]

    @pl.when(i == 0)
    def _():
        acc_ref[...] = jnp.zeros_like(acc_ref)

    # Block is (1, 2*tile_m, fft): x frame rows [0,tm), y frame rows [tm,2tm),
    # already contiguous -> one MXU matmul, no in-kernel concat/copy.
    f = fxy_ref[0]
    spec = jnp.dot(f, w_ref[...], preferred_element_type=jnp.float32)  # (2*tm, 2*nb)

    xr = spec[:tm, :nb]
    xi = spec[:tm, nb:]
    yr = spec[tm:, :nb]
    yi = spec[tm:, nb:]

    x2 = jnp.maximum(xr * xr + xi * xi, 1e-7)
    y2 = jnp.maximum(yr * yr + yi * yi, 1e-7)
    xm = jnp.sqrt(x2)
    ym = jnp.sqrt(y2)
    d = ym - xm

    acc_ref[0] += d * d
    acc_ref[1] += y2
    acc_ref[2] += 0.5 * jnp.abs(jnp.log(y2) - jnp.log(x2))   # == |log ym - log xm|

    @pl.when(i == pl.num_programs(0) - 1)
    def _():
        out_ref[0] = jnp.sum(acc_ref[0])
        out_ref[1] = jnp.sum(acc_ref[1])
        out_ref[2] = jnp.sum(acc_ref[2])


def stft_loss(x, y, fft_size=64, shift_size=16, win_length=32, tile_m=512):
    """Returns (sc_loss, mag_loss), matching STFTLoss.forward semantics."""
    assert x.shape == y.shape and x.ndim == 2
    n_bins = fft_size // 2 + 1
    nb_pad = ((n_bins + 127) // 128) * 128        # lane-aligned frequency dim
    w = _make_windowed_dft(fft_size, win_length, nb_pad).astype(jnp.bfloat16)

    fx = _frame(x.astype(jnp.float32), fft_size, shift_size).reshape(-1, fft_size)
    fy = _frame(y.astype(jnp.float32), fft_size, shift_size).reshape(-1, fft_size)
    m_tot = fx.shape[0]                           # B * n_frames

    # Shrink tile for tiny inputs; keep a multiple of 16 (bf16 sublane packing).
    tile_m = int(min(tile_m, ((m_tot + 15) // 16) * 16))
    m_pad = ((m_tot + tile_m - 1) // tile_m) * tile_m
    pad_rows = m_pad - m_tot
    n_tiles = m_pad // tile_m

    fx = jnp.pad(fx, ((0, pad_rows), (0, 0))).astype(jnp.bfloat16)
    fy = jnp.pad(fy, ((0, pad_rows), (0, 0))).astype(jnp.bfloat16)
    # Interleave per tile: block i holds x rows then y rows, contiguously.
    fxy = jnp.concatenate(
        [fx.reshape(n_tiles, tile_m, fft_size),
         fy.reshape(n_tiles, tile_m, fft_size)], axis=1)      # (n_tiles, 2*tile_m, fft)

    sums = pl.pallas_call(
        _stft_loss_kernel,
        out_shape=jax.ShapeDtypeStruct((3,), jnp.float32),
        grid_spec=pltpu.PrefetchScalarGridSpec(
            num_scalar_prefetch=0,
            grid=(n_tiles,),
            in_specs=[
                pl.BlockSpec((1, 2 * tile_m, fft_size), lambda i: (i, 0, 0)),  # frames x|y
                pl.BlockSpec((fft_size, 2 * nb_pad), lambda i: (0, 0)),        # fused DFT W (resident)
            ],
            out_specs=pl.BlockSpec(memory_space=pltpu.MemorySpace.SMEM),
            scratch_shapes=[pltpu.VMEM((3, tile_m, nb_pad), jnp.float32)],
        ),
        compiler_params=pltpu.CompilerParams(dimension_semantics=("arbitrary",)),
    )(fxy, w)

    sc_num, sc_den_raw, mag_sum = sums[0], sums[1], sums[2]
    # Zero pad rows / pad columns give exactly 0 spectra -> clamp floor 1e-7 each,
    # which only leaks into the SC denominator; remove it analytically.
    spurious = (m_pad * nb_pad - m_tot * n_bins) * 1e-7
    sc_den = sc_den_raw - jnp.float32(spurious)
    sc_loss = jnp.sqrt(sc_num) / jnp.sqrt(sc_den)             # ||y-x||_F / ||y||_F
    mag_loss = mag_sum / jnp.float32(m_tot * n_bins)          # L1 mean of log-mags
    return sc_loss, mag_loss


def _ref_losses(x, y, fft_size, hop, win_length):
    """Pure-JAX reference (rfft) reproducing the PyTorch forward."""
    win = _hann_periodic(win_length)
    left = (fft_size - win_length) // 2
    win_pad = jnp.asarray(
        np.pad(win, (left, fft_size - win_length - left)), jnp.float32)

    def mag(sig):
        frames = _frame(sig.astype(jnp.float32), fft_size, hop) * win_pad
        spec = jnp.fft.rfft(frames, axis=-1)
        return jnp.sqrt(jnp.maximum(jnp.real(spec) ** 2 + jnp.imag(spec) ** 2, 1e-7))

    xm, ym = mag(x), mag(y)
    sc = jnp.linalg.norm((ym - xm).ravel()) / jnp.linalg.norm(ym.ravel())
    mg = jnp.mean(jnp.abs(jnp.log(ym) - jnp.log(xm)))
    return sc, mg


if __name__ == "__main__":
    key = jax.random.PRNGKey(0)
    kx, ky = jax.random.split(key)
    B, T = 2, 256
    fft_size, hop, win_length = 64, 16, 32    # scaled-down analogue of (1024, 120, 600)

    x = jax.random.normal(kx, (B, T), dtype=jnp.float32)
    y = jax.random.normal(ky, (B, T), dtype=jnp.float32)

    sc, mg = stft_loss(x, y, fft_size, hop, win_length)
    jax.block_until_ready((sc, mg))

    sc_ref, mg_ref = _ref_losses(x, y, fft_size, hop, win_length)
    np.testing.assert_allclose(float(sc), float(sc_ref), rtol=5e-2, atol=5e-3)
    np.testing.assert_allclose(float(mg), float(mg_ref), rtol=5e-2, atol=5e-3)

    print("KERNEL_OK")
</pallas_src>

<mosaic_0001>
module attributes {stable_mosaic.version = 11 : i64} {
  func.func @_stft_loss_kernel(%arg0: i32, %arg1: memref<1x96x64xbf16, #tpu.memory_space<vmem>>, %arg2: memref<64x256xbf16, #tpu.memory_space<vmem>>, %arg3: memref<3xf32, #tpu.memory_space<smem>>, %arg4: memref<3x48x128xf32, #tpu.memory_space<vmem>>) attributes {dimension_semantics = [#tpu.dimension_semantics<arbitrary>], iteration_bounds = array<i64: 1>, scalar_prefetch = 0 : i64, scratch_operands = 1 : i64, tpu.core_type = #tpu.core_type<tc>, window_params = [{transform_indices = @transform_0, window_bounds = array<i64: 1, 96, 64>}, {pipeline_mode = #tpu.pipeline_mode<synchronous>, transform_indices = @transform_1, window_bounds = array<i64: 64, 256>}, {transform_indices = @transform_2, window_bounds = array<i64: 3>}]} {
    %c0_i32 = arith.constant 0 : i32
    %0 = arith.cmpi eq, %arg0, %c0_i32 : i32
    %1 = arith.extui %0 : i1 to i32
    %c0_i32_0 = arith.constant 0 : i32
    %2 = arith.cmpi ne, %1, %c0_i32_0 : i32
    scf.if %2 {
      %cst_26 = arith.constant 0.000000e+00 : f32
      %52 = vector.broadcast %cst_26 : f32 to vector<3x48x128xf32>
      %c0_27 = arith.constant 0 : index
      %c0_28 = arith.constant 0 : index
      %c0_29 = arith.constant 0 : index
      %53 = vector.load %arg4[%c0_27, %c0_28, %c0_29] : memref<3x48x128xf32, #tpu.memory_space<vmem>>, vector<3x48x128xf32>
      tpu.vector_store %arg4[%c0_27, %c0_28, %c0_29], %52 {strides = array<i32>} : memref<3x48x128xf32, #tpu.memory_space<vmem>>, vector<3x48x128xf32>,
    } else {
    }
    %c0 = arith.constant 0 : index
    %c0_1 = arith.constant 0 : index
    %c0_2 = arith.constant 0 : index
    %3 = vector.load %arg1[%c0, %c0_1, %c0_2] : memref<1x96x64xbf16, #tpu.memory_space<vmem>>, vector<1x96x64xbf16>
    %4 = vector.shape_cast %3 : vector<1x96x64xbf16> to vector<96x64xbf16>
    %c0_3 = arith.constant 0 : index
    %c0_4 = arith.constant 0 : index
    %5 = vector.load %arg2[%c0_3, %c0_4] : memref<64x256xbf16, #tpu.memory_space<vmem>>, vector<64x256xbf16>
    %cst = arith.constant dense<0.000000e+00> : vector<96x256xf32>
    %6 = tpu.matmul %4, %5, %cst {dimension_numbers = #tpu.dot_dimension_numbers<[1], [0], [0], [1], [0, 0, 1, 1], [], []>} : vector<96x64xbf16>, vector<64x256xbf16>, vector<96x256xf32> -> vector<96x256xf32>
    %7 = vector.extract_strided_slice %6 {offsets = [0, 0], sizes = [48, 128], strides = [1, 1]} : vector<96x256xf32> to vector<48x128xf32>
    %8 = vector.extract_strided_slice %6 {offsets = [0, 128], sizes = [48, 128], strides = [1, 1]} : vector<96x256xf32> to vector<48x128xf32>
    %9 = vector.extract_strided_slice %6 {offsets = [48, 0], sizes = [48, 128], strides = [1, 1]} : vector<96x256xf32> to vector<48x128xf32>
    %10 = vector.extract_strided_slice %6 {offsets = [48, 128], sizes = [48, 128], strides = [1, 1]} : vector<96x256xf32> to vector<48x128xf32>
    %11 = arith.mulf %7, %7 : vector<48x128xf32>
    %12 = arith.mulf %8, %8 : vector<48x128xf32>
    %13 = arith.addf %11, %12 : vector<48x128xf32>
    %cst_5 = arith.constant 1.000000e-07 : f32
    %14 = vector.broadcast %cst_5 : f32 to vector<48x128xf32>
    %15 = arith.maximumf %13, %14 : vector<48x128xf32>
    %16 = arith.mulf %9, %9 : vector<48x128xf32>
    %17 = arith.mulf %10, %10 : vector<48x128xf32>
    %18 = arith.addf %16, %17 : vector<48x128xf32>
    %cst_6 = arith.constant 1.000000e-07 : f32
    %19 = vector.broadcast %cst_6 : f32 to vector<48x128xf32>
    %20 = arith.maximumf %18, %19 : vector<48x128xf32>
    %21 = math.sqrt %15 : vector<48x128xf32>
    %22 = math.sqrt %20 : vector<48x128xf32>
    %23 = arith.subf %22, %21 : vector<48x128xf32>
    %c0_7 = arith.constant 0 : index
    %c0_8 = arith.constant 0 : index
    %c0_9 = arith.constant 0 : index
    %24 = vector.load %arg4[%c0_7, %c0_8, %c0_9] : memref<3x48x128xf32, #tpu.memory_space<vmem>>, vector<1x48x128xf32>
    %25 = vector.shape_cast %24 : vector<1x48x128xf32> to vector<48x128xf32>
    %26 = arith.mulf %23, %23 : vector<48x128xf32>
    %27 = arith.addf %25, %26 : vector<48x128xf32>
    %c0_10 = arith.constant 0 : index
    %c0_11 = arith.constant 0 : index
    %c0_12 = arith.constant 0 : index
    %28 = vector.load %arg4[%c0_10, %c0_11, %c0_12] : memref<3x48x128xf32, #tpu.memory_space<vmem>>, vector<1x48x128xf32>
    %29 = vector.shape_cast %28 : vector<1x48x128xf32> to vector<48x128xf32>
    %30 = vector.shape_cast %27 : vector<48x128xf32> to vector<1x48x128xf32>
    tpu.vector_store %arg4[%c0_10, %c0_11, %c0_12], %30 {strides = array<i32>} : memref<3x48x128xf32, #tpu.memory_space<vmem>>, vector<1x48x128xf32>,
    %c1 = arith.constant 1 : index
    %c0_13 = arith.constant 0 : index
    %c0_14 = arith.constant 0 : index
    %31 = vector.load %arg4[%c1, %c0_13, %c0_14] : memref<3x48x128xf32, #tpu.memory_space<vmem>>, vector<1x48x128xf32>
    %32 = vector.shape_cast %31 : vector<1x48x128xf32> to vector<48x128xf32>
    %33 = arith.addf %32, %20 : vector<48x128xf32>
    %c1_15 = arith.constant 1 : index
    %c0_16 = arith.constant 0 : index
    %c0_17 = arith.constant 0 : index
    %34 = vector.load %arg4[%c1_15, %c0_16, %c0_17] : memref<3x48x128xf32, #tpu.memory_space<vmem>>, vector<1x48x128xf32>
    %35 = vector.shape_cast %34 : vector<1x48x128xf32> to vector<48x128xf32>
    %36 = vector.shape_cast %33 : vector<48x128xf32> to vector<1x48x128xf32>
    tpu.vector_store %arg4[%c1_15, %c0_16, %c0_17], %36 {strides = array<i32>} : memref<3x48x128xf32, #tpu.memory_space<vmem>>, vector<1x48x128xf32>,
    %c2 = arith.constant 2 : index
    %c0_18 = arith.constant 0 : index
    %c0_19 = arith.constant 0 : index
    %37 = vector.load %arg4[%c2, %c0_18, %c0_19] : memref<3x48x128xf32, #tpu.memory_space<vmem>>, vector<1x48x128xf32>
    %38 = vector.shape_cast %37 : vector<1x48x128xf32> to vector<48x128xf32>
    %39 = math.log %20 : vector<48x128xf32>
    %40 = math.log %15 : vector<48x128xf32>
    %41 = arith.subf %39, %40 : vector<48x128xf32>
    %42 = math.absf %41 : vector<48x128xf32>
    %cst_20 = arith.constant 5.000000e-01 : f32
    %43 = vector.broadcast %cst_20 : f32 to vector<48x128xf32>
    %44 = arith.mulf %43, %42 : vector<48x128xf32>
    %45 = arith.addf %38, %44 : vector<48x128xf32>
    %c2_21 = arith.constant 2 : index
    %c0_22 = arith.constant 0 : index
    %c0_23 = arith.constant 0 : index
    %46 = vector.load %arg4[%c2_21, %c0_22, %c0_23] : memref<3x48x128xf32, #tpu.memory_space<vmem>>, vector<1x48x128xf32>
    %47 = vector.shape_cast %46 : vector<1x48x128xf32> to vector<48x128xf32>
    %48 = vector.shape_cast %45 : vector<48x128xf32> to vector<1x48x128xf32>
    tpu.vector_store %arg4[%c2_21, %c0_22, %c0_23], %48 {strides = array<i32>} : memref<3x48x128xf32, #tpu.memory_space<vmem>>, vector<1x48x128xf32>,
    %c0_i32_24 = arith.constant 0 : i32
    %49 = arith.cmpi eq, %arg0, %c0_i32_24 : i32
    %50 = arith.extui %49 : i1 to i32
    %c0_i32_25 = arith.constant 0 : i32
    %51 = arith.cmpi ne, %50, %c0_i32_25 : i32
    scf.if %51 {
      %c0_26 = arith.constant 0 : index
      %c0_27 = arith.constant 0 : index
      %c0_28 = arith.constant 0 : index
      %52 = vector.load %arg4[%c0_26, %c0_27, %c0_28] : memref<3x48x128xf32, #tpu.memory_space<vmem>>, vector<1x48x128xf32>
      %53 = vector.shape_cast %52 : vector<1x48x128xf32> to vector<48x128xf32>
      %54 = vector.shape_cast %53 : vector<48x128xf32> to vector<1x48x128xf32>
      %cst_29 = arith.constant dense<0.000000e+00> : vector<1xf32>
      %55 = vector.multi_reduction <add>, %54, %cst_29 [1, 2] : vector<1x48x128xf32> to vector<1xf32>
      %56 = vector.shape_cast %55 : vector<1xf32> to vector<1x1x1xf32>
      %57 = vector.extract %56[0, 0, 0] : f32 from vector<1x1x1xf32>
      %c0_30 = arith.constant 0 : index
      %58 = memref.load %arg3[%c0_30] : memref<3xf32, #tpu.memory_space<smem>>
      memref.store %57, %arg3[%c0_30] : memref<3xf32, #tpu.memory_space<smem>>
      %c1_31 = arith.constant 1 : index
      %c0_32 = arith.constant 0 : index
      %c0_33 = arith.constant 0 : index
      %59 = vector.load %arg4[%c1_31, %c0_32, %c0_33] : memref<3x48x128xf32, #tpu.memory_space<vmem>>, vector<1x48x128xf32>
      %60 = vector.shape_cast %59 : vector<1x48x128xf32> to vector<48x128xf32>
      %61 = vector.shape_cast %60 : vector<48x128xf32> to vector<1x48x128xf32>
      %cst_34 = arith.constant dense<0.000000e+00> : vector<1xf32>
      %62 = vector.multi_reduction <add>, %61, %cst_34 [1, 2] : vector<1x48x128xf32> to vector<1xf32>
      %63 = vector.shape_cast %62 : vector<1xf32> to vector<1x1x1xf32>
      %64 = vector.extract %63[0, 0, 0] : f32 from vector<1x1x1xf32>
      %c1_35 = arith.constant 1 : index
      %65 = memref.load %arg3[%c1_35] : memref<3xf32, #tpu.memory_space<smem>>
      memref.store %64, %arg3[%c1_35] : memref<3xf32, #tpu.memory_space<smem>>
      %c2_36 = arith.constant 2 : index
      %c0_37 = arith.constant 0 : index
      %c0_38 = arith.constant 0 : index
      %66 = vector.load %arg4[%c2_36, %c0_37, %c0_38] : memref<3x48x128xf32, #tpu.memory_space<vmem>>, vector<1x48x128xf32>
      %67 = vector.shape_cast %66 : vector<1x48x128xf32> to vector<48x128xf32>
      %68 = vector.shape_cast %67 : vector<48x128xf32> to vector<1x48x128xf32>
      %cst_39 = arith.constant dense<0.000000e+00> : vector<1xf32>
      %69 = vector.multi_reduction <add>, %68, %cst_39 [1, 2] : vector<1x48x128xf32> to vector<1xf32>
      %70 = vector.shape_cast %69 : vector<1xf32> to vector<1x1x1xf32>
      %71 = vector.extract %70[0, 0, 0] : f32 from vector<1x1x1xf32>
      %c2_40 = arith.constant 2 : index
      %72 = memref.load %arg3[%c2_40] : memref<3xf32, #tpu.memory_space<smem>>
      memref.store %71, %arg3[%c2_40] : memref<3xf32, #tpu.memory_space<smem>>
    } else {
    }
    return
  }
  func.func @transform_0(%arg0: i32) -> (i32, i32, i32) {
    %c0_i32 = arith.constant 0 : i32
    %c0_i32_0 = arith.constant 0 : i32
    %c0_i32_1 = arith.constant 0 : i32
    return %arg0, %c0_i32, %c0_i32_0 : i32, i32, i32
  }
  func.func @transform_1(%arg0: i32) -> (i32, i32) {
    %c0_i32 = arith.constant 0 : i32
    %c0_i32_0 = arith.constant 0 : i32
    %c0_i32_1 = arith.constant 0 : i32
    return %c0_i32, %c0_i32_0 : i32, i32
  }
  func.func @transform_2(%arg0: i32) -> i32 {
    %c0_i32 = arith.constant 0 : i32
    %c0_i32_0 = arith.constant 0 : i32
    return %c0_i32 : i32
  }
}

</mosaic_0001>

<bundles_post_ra>
// kernel: tpu_custom_call.1
= control target key start
LH: loop header
LB: loop body
LE: loop exit
PB: predicated region body
PF: predicated region fallthrough
CT: control target
= control target key end

     0   :  { %v675_v2 = vmov 0   ;;  %s919_s0 = inlined_call_operand.vmem [shape: bf16[1,96,64], index: 0, kind: input, shape index: {}]   ;;  %s920_s1 = inlined_call_operand.vmem [shape: bf16[64,256], index: 1, kind: input, shape index: {}]   ;;  %s921_s2 = inlined_call_operand.hbm [shape: f32[3], index: 2, kind: output, shape index: {}]  }
   0x1   :  { %v597_v0 = vld [vmem:[%s920_s1 + $0x4] ss:$8 sps:$4 sm:$0xff]   ;;  %v599_v1 = vld [vmem:[%s920_s1] ss:$8 sps:$4 sm:$0xff]   ;;  %176 = vmatprep.mubr.bf16.mxu0 %v675_v2  ;;  %206 = vmatprep.mubr.bf16.mxu1 %v675_v2  ;;  %v600_v3 = vld [vmem:[%s920_s1 + $0x14] ss:$8 sps:$4 sm:$0xff]  }
   0x2   :  { %144 = vmatprep.subr.bf16.mxu0 %v597_v0  ;;  %581 = vmatprep.subr.bf16.mxu1 %v597_v0  ;;  %v602_v4 = vld [vmem:[%s920_s1 + $0x10] ss:$8 sps:$4 sm:$0xff]   ;;  %v603_v5 = vld [vmem:[%s920_s1 + $0x24] ss:$8 sps:$4 sm:$0xff]   ;;  %v605_v6 = vld [vmem:[%s920_s1 + $0x20] ss:$8 sps:$4 sm:$0xff]  }
   0x3   :  { %145 = vmatpush1.bf16.msra.mxu0 %v599_v1  ;;  %585 = vmatpush1.bf16.msra.mxu1 %v599_v1  ;;  %v606_v7 = vld [vmem:[%s920_s1 + $0x34] ss:$8 sps:$4 sm:$0xff]   ;;  %v608_v8 = vld [vmem:[%s920_s1 + $0x30] ss:$8 sps:$4 sm:$0xff]  }
   0x4   :  { %146 = vmatprep.subr.bf16.mxu0 %v600_v3  ;;  %582 = vmatprep.subr.bf16.mxu1 %v600_v3 }
   0x7   :  { %147 = vmatpush1.bf16.msra.mxu0 %v602_v4  ;;  %586 = vmatpush1.bf16.msra.mxu1 %v602_v4 }
   0x8   :  { %148 = vmatprep.subr.bf16.mxu0 %v603_v5  ;;  %583 = vmatprep.subr.bf16.mxu1 %v603_v5 }
   0xb   :  { %149 = vmatpush1.bf16.msra.mxu0 %v605_v6  ;;  %587 = vmatpush1.bf16.msra.mxu1 %v605_v6 }
   0xc   :  { %7 = vsyncpa [#allocation4], 0  ;;  %150 = vmatprep.subr.bf16.mxu0 %v606_v7  ;;  %584 = vmatprep.subr.bf16.mxu1 %v606_v7  ;;  %v609_v9 = vld [vmem:[%s919_s0] sm:$0xff]   ;;  %v610_v10 = vld [vmem:[%s919_s0 + $0x18] sm:$0xff]   ;;  %vm125_vm0 = vcmask 523264   ;;  %s663_s12 = scalar_lea.hbm %s921_s2, 16 }
   0xd   :  { %v611_v11 = vld [vmem:[%s919_s0 + $0x8] sm:$0xff]   ;;  %v612_v12 = vld [vmem:[%s919_s0 + $0x20] sm:$0xff]   ;;  %v613_v13 = vld [vmem:[%s919_s0 + $0x10] sm:$0xff]   ;;  %p664_p0 = scmp.ne.s32.totalorder %s921_s2, %s663_s12  ;;  %p667_p1 = scmp.lt.u32.totalorder %s663_s12, %s921_s2 }
   0xe   :  { %v614_v14 = vld [vmem:[%s919_s0 + $0x28] sm:$0xff]  }
   0xf   :  { %151 = vmatpush1.bf16.msra.mxu0 %v608_v8  ;;  %588 = vmatpush1.bf16.msra.mxu1 %v608_v8  ;;  %p669_p2 = pnand %p667_p1, %p664_p0 }
  0x12   :  { %575 = vmatmul.mubr.msk.bf16.vlgmr.msra.gmra.mrb[0].mxu0 %vm125_vm0, %v609_v9  ;;  %578 = vmatmul.mubr.msk.bf16.vlgmr.msra.gmra.mrb[0].mxu1 %vm125_vm0, %v610_v10 }
  0x13   :  { %186 = vmatprep.mubr.bf16.mxu0 %v675_v2  ;;  %216 = vmatprep.mubr.bf16.mxu1 %v675_v2 }
  0x1a   :  { %576 = vmatmul.mubr.msk.bf16.gmra.mrb[4].mxu0 %vm125_vm0, %v611_v11  ;;  %579 = vmatmul.mubr.msk.bf16.gmra.mrb[4].mxu1 %vm125_vm0, %v612_v12 }
  0x1b   :  { %196 = vmatprep.mubr.bf16.mxu0 %v675_v2  ;;  %226 = vmatprep.mubr.bf16.mxu1 %v675_v2 }
  0x22   :  { %577 = vmatmul.mubr.msk.bf16.gmra.mrb[8].mxu0 %vm125_vm0, %v613_v13  ;;  %580 = vmatmul.mubr.msk.bf16.gmra.mrb[8].mxu1 %vm125_vm0, %v614_v14 }
  0xe5   :  { %v178_v15 = vpop.f32.mrb[0].mxu0  ;;  %v208_v16 = vpop.f32.mrb[0].mxu1 }
  0xe6   :  { %v237_v17 = vmul.f32 %v178_v15, %v178_v15  ;;  %v261_v18 = vmul.f32 %v208_v16, %v208_v16  ;;  %v180_v19 = vpop.f32.mrb[1].mxu0  ;;  %v210_v20 = vpop.f32.mrb[1].mxu1 }
  0xe7   :  { %v243_v21 = vmul.f32 %v180_v19, %v180_v19  ;;  %v267_v22 = vmul.f32 %v210_v20, %v210_v20  ;;  %v182_v23 = vpop.f32.mrb[2].mxu0  ;;  %v212_v24 = vpop.f32.mrb[2].mxu1 }
  0xe8   :  { %v238_v25 = vmul.f32 %v182_v23, %v182_v23  ;;  %v262_v26 = vmul.f32 %v212_v24, %v212_v24  ;;  %v184_v27 = vpop.f32.mrb[3].mxu0  ;;  %v214_v28 = vpop.f32.mrb[3].mxu1 }
  0xe9   :  { %v249_v29 = vadd.f32 %v243_v21, %v237_v17  ;;  %v273_v30 = vadd.f32 %v267_v22, %v261_v18  ;;  %v244_v31 = vmul.f32 %v184_v27, %v184_v27  ;;  %v268_v32 = vmul.f32 %v214_v28, %v214_v28 }
  0xeb   :  { %v734_v33 = vmax.f32 %v249_v29, 1e-07  ;;  %v736_v34 = vmax.f32 %v273_v30, 1e-07  ;;  %v250_v35 = vadd.f32 %v244_v31, %v238_v25  ;;  %v274_v36 = vadd.f32 %v268_v32, %v262_v26 }
  0xed   :  { %615 = vrsqrt.f32 %v734_v33  ;;  %v739_v37 = vmax.f32 %v250_v35, 1e-07  ;;  %v741_v38 = vmax.f32 %v274_v36, 1e-07  ;;  %v188_v39 = vpop.f32.mrb[4].mxu0  ;;  %v218_v40 = vpop.f32.mrb[4].mxu1 }
  0xee   :  { %v239_v41 = vmul.f32 %v188_v39, %v188_v39  ;;  %v263_v42 = vmul.f32 %v218_v40, %v218_v40  ;;  %v190_v43 = vpop.f32.mrb[5].mxu0  ;;  %v220_v44 = vpop.f32.mrb[5].mxu1  ;;  %617 = vlog2.f32 %v736_v34  ;;  %vm287_vm1 = vcmp.eq.f32.partialorder %v734_v33, inf }
  0xef   :  { %619 = vrsqrt.f32 %v739_v37  ;;  %v245_v45 = vmul.f32 %v190_v43, %v190_v43  ;;  %v269_v46 = vmul.f32 %v220_v44, %v220_v44  ;;  %v192_v47 = vpop.f32.mrb[6].mxu0  ;;  %v222_v48 = vpop.f32.mrb[6].mxu1  ;;  %v759_v1 = vadd.f32 %v741_v38, %v736_v34 }
  0xf0   :  { %v240_v49 = vmul.f32 %v192_v47, %v192_v47  ;;  %v264_v50 = vmul.f32 %v222_v48, %v222_v48  ;;  %v194_v51 = vpop.f32.mrb[7].mxu0  ;;  %v224_v52 = vpop.f32.mrb[7].mxu1  ;;  %621 = vlog2.f32 %v741_v38  ;;  %vm289_vm2 = vcmp.eq.f32.partialorder %v734_v33, 0.0 }
  0xf1   :  { %v251_v53 = vadd.f32 %v245_v45, %v239_v41  ;;  %v275_v54 = vadd.f32 %v269_v46, %v263_v42  ;;  %v246_v55 = vmul.f32 %v194_v51, %v194_v51  ;;  %v270_v56 = vmul.f32 %v224_v52, %v224_v52 }
  0xf2   :  { %623 = vlog2.f32 %v734_v33  ;;  %v290_v44 = vand.u32 2147483648, %v734_v33  ;;  %vm294_vm3 = vcmp.eq.f32.partialorder %v739_v37, inf  ;;  %vm296_vm4 = vcmp.eq.f32.partialorder %v739_v37, 0.0 }
  0xf3   :  { %v747_v57 = vmax.f32 %v251_v53, 1e-07  ;;  %v749_v58 = vmax.f32 %v275_v54, 1e-07  ;;  %v252_v59 = vadd.f32 %v246_v55, %v240_v49  ;;  %v276_v60 = vadd.f32 %v270_v56, %v264_v50 }
  0xf4   :  { %625 = vlog2.f32 %v739_v37  ;;  %vm329_vm10 = vcmp.eq.f32.partialorder %v736_v34, inf  ;;  %vm331_vm12 = vcmp.eq.f32.partialorder %v736_v34, 0.0  ;;  %vm336_vm13 = vcmp.eq.f32.partialorder %v741_v38, inf }
  0xf5   :  { %v752_v61 = vmax.f32 %v252_v59, 1e-07  ;;  %v754_v62 = vmax.f32 %v276_v60, 1e-07  ;;  %v198_v63 = vpop.f32.mrb[8].mxu0  ;;  %v228_v0 = vpop.f32.mrb[8].mxu1  ;;  %627 = vlog2.f32 %v749_v58 }
  0xf6   :  { %v241_v2 = vmul.f32 %v198_v63, %v198_v63  ;;  %v265_v3 = vmul.f32 %v228_v0, %v228_v0  ;;  %v200_v4 = vpop.f32.mrb[9].mxu0  ;;  %v230_v5 = vpop.f32.mrb[9].mxu1  ;;  %629 = vlog2.f32 %v747_v57  ;;  %v297_v60 = vand.u32 2147483648, %v739_v37 }
  0xf7   :  { %v616_v6 = vpop.eup %615  ;;  %v247_v7 = vmul.f32 %v200_v4, %v200_v4  ;;  %v271_v8 = vmul.f32 %v230_v5, %v230_v5  ;;  %v202_v9 = vpop.f32.mrb[10].mxu0  ;;  %631 = vlog2.f32 %v754_v62  ;;  %vm301_vm5 = vcmp.eq.f32.partialorder %v747_v57, inf }
  0xf8   :  { %v232_v10 = vpop.f32.mrb[10].mxu1  ;;  %v618_v11 = vpop.eup %617  ;;  %v242_v12 = vmul.f32 %v202_v9, %v202_v9  ;;  %633 = vlog2.f32 %v752_v61  ;;  %v286_v35 = vmul.f32 %v616_v6, %v734_v33  ;;  %v332_v63 = vand.u32 2147483648, %v736_v34 }
  0xf9   :  { %v266_v13 = vmul.f32 %v232_v10, %v232_v10  ;;  %v204_v14 = vpop.f32.mrb[11].mxu0  ;;  %v234_v15 = vpop.f32.mrb[11].mxu1  ;;  %v253_v17 = vadd.f32 %v247_v7, %v241_v2  ;;  %v277_v18 = vadd.f32 %v271_v8, %v265_v3  ;;  %v426_v22 = vmul.f32 0.6931472, %v618_v11 }
  0xfa   :  { %v620_v16 = vpop.eup %619  ;;  %v248_v19 = vmul.f32 %v204_v14, %v204_v14  ;;  %v272_v20 = vmul.f32 %v234_v15, %v234_v15  ;;  %635 = vrsqrt.f32 %v747_v57  ;;  %v288_v51 = vsel %vm287_vm1, %v734_v33, %v286_v35 }
  0xfb   :  { %v622_v21 = vpop.eup %621  ;;  %v765_v23 = vmax.f32 %v253_v17, 1e-07  ;;  %v767_v24 = vmax.f32 %v277_v18, 1e-07  ;;  %v293_v41 = vmul.f32 %v620_v16, %v739_v37  ;;  %vm303_vm6 = vcmp.eq.f32.partialorder %v747_v57, 0.0 }
  0xfc   :  { %v254_v25 = vadd.f32 %v248_v19, %v242_v12  ;;  %v278_v26 = vadd.f32 %v272_v20, %v266_v13  ;;  %v624_v27 = vpop.eup %623  ;;  %v428_v28 = vmul.f32 0.6931472, %v622_v21  ;;  %v797_v4 = vsel %vm289_vm2, %v290_v44, %v288_v51 }
  0xfd   :  { %637 = vlog2.f32 %v767_v24  ;;  %v438_v31 = vmul.f32 0.6931472, %v624_v27  ;;  %v295_v55 = vsel %vm294_vm3, %v739_v37, %v293_v41  ;;  %v304_v6 = vand.u32 2147483648, %v747_v57 }
  0xfe   :  { %v769_v29 = vmax.f32 %v254_v25, 1e-07  ;;  %v771_v30 = vmax.f32 %v278_v26, 1e-07  ;;  %v626_v32 = vpop.eup %625  ;;  %639 = vlog2.f32 %v765_v23  ;;  %v801_v5 = vsel %vm296_vm4, %v297_v60, %v295_v55 }
  0xff   :  { %v628_v36 = vpop.eup %627  ;;  %v440_v39 = vmul.f32 0.6931472, %v626_v32  ;;  %v449_v40 = vsub.f32 %v426_v22, %v438_v31  ;;  %vm308_vm7 = vcmp.eq.f32.partialorder %v752_v61, inf  ;;  %v311_v13 = vand.u32 2147483648, %v752_v61 }
 0x100   :  { %641 = vlog2.f32 %v771_v30  ;;  %v630_v42 = vpop.eup %629  ;;  %v430_v43 = vmul.f32 0.6931472, %v628_v36  ;;  %vm315_vm8 = vcmp.eq.f32.partialorder %v765_v23, inf  ;;  %vm310_vm9 = vcmp.eq.f32.partialorder %v752_v61, 0.0 }
 0x101   :  { %643 = vlog2.f32 %v769_v29  ;;  %v632_v45 = vpop.eup %631  ;;  %v442_v46 = vmul.f32 0.6931472, %v630_v42  ;;  %v450_v47 = vsub.f32 %v428_v28, %v440_v39  ;;  %v455_v48 = vand.u32 2147483647, %v449_v40 }
 0x102   :  { %645 = vrsqrt.f32 %v752_v61  ;;  %v634_v49 = vpop.eup %633  ;;  %v432_v50 = vmul.f32 0.6931472, %v632_v45  ;;  %v318_v19 = vand.u32 2147483648, %v765_v23  ;;  %v325_v20 = vand.u32 2147483648, %v769_v29 }
 0x103   :  { %647 = vrsqrt.f32 %v765_v23  ;;  %v444_v52 = vmul.f32 0.6931472, %v634_v49  ;;  %v451_v53 = vsub.f32 %v430_v43, %v442_v46  ;;  %v456_v54 = vand.u32 2147483647, %v450_v47 }
 0x104   :  { %v636_v56 = vpop.eup %635  ;;  %v461_v59 = vmul.f32 0.5, %v455_v48  ;;  %649 = vrsqrt.f32 %v769_v29  ;;  %vm317_vm11 = vcmp.eq.f32.partialorder %v765_v23, 0.0  ;;  %v339_v32 = vand.u32 2147483648, %v741_v38 }
 0x105   :  { %v452_v0 = vsub.f32 %v432_v50, %v444_v52  ;;  %v457_v2 = vand.u32 2147483647, %v451_v53  ;;  %v462_v3 = vmul.f32 0.5, %v456_v54  ;;  %651 = vrsqrt.f32 %v736_v34 }
 0x106   :  { %v300_v11 = vmul.f32 %v636_v56, %v747_v57  ;;  %653 = vrsqrt.f32 %v741_v38  ;;  %vm322_vm14 = vcmp.eq.f32.partialorder %v769_v29, inf  ;;  %vm338_vm15 = vcmp.eq.f32.partialorder %v741_v38, 0.0 }
 0x107   :  { %v638_v7 = vpop.eup %637  ;;  %v458_v8 = vand.u32 2147483647, %v452_v0  ;;  %v463_v9 = vmul.f32 0.5, %v457_v2  ;;  %v532_v10 = vadd.f32 %v462_v3, %v461_v59  ;;  %655 = vrsqrt.f32 %v749_v58 }
 0x108   :  { %v640_v12 = vpop.eup %639  ;;  %v434_v33 = vmul.f32 0.6931472, %v638_v7  ;;  %657 = vrsqrt.f32 %v754_v62  ;;  %v302_v27 = vsel %vm301_vm5, %v747_v57, %v300_v11  ;;  %vm343_vm0 = vcmp.eq.f32.partialorder %v749_v58, inf }
 0x109   :  { %v446_v14 = vmul.f32 0.6931472, %v640_v12  ;;  %v464_v15 = vmul.f32 0.5, %v458_v8  ;;  %v533_v16 = vadd.f32 %v532_v10, %v463_v9  ;;  %659 = vrsqrt.f32 %v767_v24 }
 0x10a   :  { %v642_v37 = vpop.eup %641  ;;  %v305_v40 = vsel %vm303_vm6, %v304_v6, %v302_v27  ;;  %vm345_vm1 = vcmp.eq.f32.partialorder %v749_v58, 0.0  ;;  %v346_v41 = vand.u32 2147483648, %v749_v58  ;;  %661 = vrsqrt.f32 %v771_v30 }
 0x10b   :  { %v644_v17 = vpop.eup %643  ;;  %v436_v18 = vmul.f32 0.6931472, %v642_v37  ;;  %v453_v25 = vsub.f32 %v434_v33, %v446_v14  ;;  %v534_v26 = vadd.f32 %v533_v16, %v464_v15  ;;  %vm350_vm2 = vcmp.eq.f32.partialorder %v754_v62, inf }
 0x10c   :  { %v646_v21 = vpop.eup %645  ;;  %v448_v22 = vmul.f32 0.6931472, %v644_v17  ;;  %vm352_vm3 = vcmp.eq.f32.partialorder %v754_v62, 0.0  ;;  %v353_v47 = vand.u32 2147483648, %v754_v62  ;;  %vm357_vm4 = vcmp.eq.f32.partialorder %v767_v24, inf }
 0x10d   :  { %v648_v28 = vpop.eup %647  ;;  %v307_v31 = vmul.f32 %v646_v21, %v752_v61  ;;  %v459_v36 = vand.u32 2147483647, %v453_v25  ;;  %vm324_vm5 = vcmp.eq.f32.partialorder %v769_v29, 0.0  ;;  %v511_v51 = vadd.f32 %v759_v1, %v749_v58 }
 0x10e   :  { %v454_v35 = vsub.f32 %v436_v18, %v448_v22  ;;  %v314_v39 = vmul.f32 %v648_v28, %v765_v23  ;;  %v650_v42 = vpop.eup %649  ;;  %vm359_vm6 = vcmp.eq.f32.partialorder %v767_v24, 0.0  ;;  %v360_v54 = vand.u32 2147483648, %v767_v24 }
 0x10f   :  { %v465_v44 = vmul.f32 0.5, %v459_v36  ;;  %v652_v45 = vpop.eup %651  ;;  %v309_v46 = vsel %vm308_vm7, %v752_v61, %v307_v31  ;;  %v321_v53 = vmul.f32 %v650_v42, %v769_v29  ;;  %vm364_vm7 = vcmp.eq.f32.partialorder %v771_v30, inf }
 0x110   :  { %v460_v43 = vand.u32 2147483647, %v454_v35  ;;  %v316_v57 = vsel %vm315_vm8, %v765_v23, %v314_v39  ;;  %v328_v50 = vmul.f32 %v652_v45, %v736_v34  ;;  %v654_v52 = vpop.eup %653  ;;  %v312_v59 = vsel %vm310_vm9, %v311_v13, %v309_v46 }
 0x111   :  { %v535_v49 = vadd.f32 %v534_v26, %v465_v44  ;;  %v656_v55 = vpop.eup %655  ;;  %v335_v1 = vmul.f32 %v654_v52, %v741_v38  ;;  %v319_v2 = vsel %vm317_vm11, %v318_v19, %v316_v57  ;;  %v512_v61 = vadd.f32 %v511_v51, %v754_v62 }
 0x112   :  { %v466_v48 = vmul.f32 0.5, %v460_v43  ;;  %v330_v60 = vsel %vm329_vm10, %v736_v34, %v328_v50  ;;  %v658_v0 = vpop.eup %657  ;;  %v342_v6 = vmul.f32 %v656_v55, %v749_v58  ;;  %vm366_vm8 = vcmp.eq.f32.partialorder %v771_v30, 0.0 }
 0x113   :  { %v333_v3 = vsel %vm331_vm12, %v332_v63, %v330_v60  ;;  %v337_v7 = vsel %vm336_vm13, %v741_v38, %v335_v1  ;;  %v349_v8 = vmul.f32 %v658_v0, %v754_v62  ;;  %v660_v9 = vpop.eup %659  ;;  %v323_v34 = vsel %vm322_vm14, %v769_v29, %v321_v53 }
 0x114   :  { %v536_v56 = vadd.f32 %v535_v49, %v466_v48  ;;  %v369_v23 = vsub.f32 %v333_v3, %v797_v4  ;;  %v340_v63 = vsel %vm338_vm15, %v339_v32, %v337_v7  ;;  %v344_v10 = vsel %vm343_vm0, %v749_v58, %v342_v6  ;;  %v662_v37 = vpop.eup %661 }
 0x115   :  { %v513_v11 = vadd.f32 %v512_v61, %v767_v24  ;;  %v347_v12 = vsel %vm345_vm1, %v346_v41, %v344_v10  ;;  %v351_v4 = vsel %vm350_vm2, %v754_v62, %v349_v8  ;;  %v356_v33 = vmul.f32 %v660_v9, %v767_v24 }
 0x116   :  { %537 = vadd.xlane.f32.xlu1 %v536_v56  ;;  %v370_v13 = vsub.f32 %v340_v63, %v801_v5  ;;  %v354_v38 = vsel %vm352_vm3, %v353_v47, %v351_v4  ;;  %v371_v14 = vsub.f32 %v347_v12, %v305_v40  ;;  %v381_v15 = vmul.f32 %v369_v23, %v369_v23 }
 0x117   :  { %v514_v16 = vadd.f32 %v513_v11, %v771_v30  ;;  %v358_v58 = vsel %vm357_vm4, %v767_v24, %v356_v33  ;;  %v363_v17 = vmul.f32 %v662_v37, %v771_v30  ;;  %v372_v18 = vsub.f32 %v354_v38, %v312_v59 }
 0x118   :  { %v382_v19 = vmul.f32 %v370_v13, %v370_v13  ;;  %v326_v5 = vsel %vm324_vm5, %v325_v20, %v323_v34  ;;  %v361_v62 = vsel %vm359_vm6, %v360_v54, %v358_v58  ;;  %v367_v21 = vand.u32 2147483648, %v771_v30 }
 0x119   :  { %v383_v22 = vmul.f32 %v371_v14, %v371_v14  ;;  %v365_v25 = vsel %vm364_vm7, %v771_v30, %v363_v17  ;;  %v373_v26 = vsub.f32 %v361_v62, %v319_v2  ;;  %v384_v27 = vmul.f32 %v372_v18, %v372_v18 }
 0x11a   :  { %v488_v28 = vadd.f32 %v382_v19, %v381_v15  ;;  %v368_v31 = vsel %vm366_vm8, %v367_v21, %v365_v25 }
 0x11b   :  { %v374_v32 = vsub.f32 %v368_v31, %v326_v5  ;;  %v385_v35 = vmul.f32 %v373_v26, %v373_v26 }
 0x11c   :  { %v489_v29 = vadd.f32 %v488_v28, %v383_v22 }
 0x11d   :  { %v386_v20 = vmul.f32 %v374_v32, %v374_v32 }
 0x11e   :  { %v490_v36 = vadd.f32 %v489_v29, %v384_v27 }
 0x120   :  { %v491_v24 = vadd.f32 %v490_v36, %v385_v35 }
 0x122   :  { %v492_v39 = vadd.f32 %v491_v24, %v386_v20 }
 0x124   :  { %493 = vadd.xlane.f32.xlu0 %v492_v39 }
 0x128   :  { %515 = vadd.xlane.f32.xlu0 %v514_v16 }
 0x1a3   :  { %v538_v40 = vpop.xlane.xlu1 %537 }
 0x1a4   :  { %v539_v41 = vrot.slane %v538_v40, 4 }
 0x1a6   :  { %v540_v42 = vadd.f32 %v539_v41, %v538_v40 }
 0x1a8   :  { %v541_v46 = vrot.slane %v540_v42, 2 }
 0x1aa   :  { %v542_v50 = vadd.f32 %v541_v46, %v540_v42 }
 0x1ac   :  { %v543_v55 = vrot.slane %v542_v50, 1 }
 0x1ae   :  { %v544_v60 = vadd.f32 %v543_v55, %v542_v50 }
 0x1b1   :  { %v494_v43 = vpop.xlane.xlu0 %493 }
 0x1b2   :  { %v495_v44 = vrot.slane %v494_v43, 4 }
 0x1b4   :  { %v496_v45 = vadd.f32 %v495_v44, %v494_v43 }
 0x1b5   :  { %v516_v57 = vpop.xlane.xlu0 %515 }
 0x1b6   :  { %v497_v47 = vrot.slane %v496_v45, 2  ;;  %v517_v30 = vrot.slane %v516_v57, 4 }
 0x1b8   :  { %v518_v48 = vadd.f32 %v517_v30, %v516_v57  ;;  %v498_v49 = vadd.f32 %v497_v47, %v496_v45 }
 0x1ba   :  { %v519_v51 = vrot.slane %v518_v48, 2  ;;  %v499_v52 = vrot.slane %v498_v49, 1 }
 0x1bc   :  { %v520_v53 = vadd.f32 %v519_v51, %v518_v48  ;;  %v500_v54 = vadd.f32 %v499_v52, %v498_v49 }
 0x1be   :  { %589 = vpush %v500_v54  ;;  %v521_v56 = vrot.slane %v520_v53, 1 }
 0x1c0   :  { %v522_v59 = vadd.f32 %v521_v56, %v520_v53 }
 0x1c2   :  { %591 = vpush %v522_v59 }
 0x1c3   :  { %593 = vpush %v544_v60 }
 0x1ef   :  { %s590_s0 = spop %589 }
 0x1f0   :  { %503 = sst [smem:[#allocation3]] %s590_s0 }
 0x1f3   :  { %s592_s8 = spop %591 }
 0x1f4   :  { %525 = sst [smem:[#allocation3 + $0x1]] %s592_s8  ;;  %s594_s9 = spop %593 }
 0x1f5   :  { %547 = sst [smem:[#allocation3 + $0x2]] %s594_s9 }
 0x1f6   :  { %672 = shalt.err (!%p669_p2)
}
 0x1f7   :  { %s676_s17 = smov [#allocation3]  }
 0x1f8   :  { %555 = dma.smem_to_hbm %s676_s17, 16, %s921_s2, [#allocation4]  }
 0x1f9   :  { %673 = dma.done.wait [#allocation4], 16  }
 0x1fa   :  { %674 = vsyncadd [#allocation4], 4294967280 }
 0x1fb   :  { %559 = sfence }
 0x1fc   :  { %560 = vsyncpa [#allocation4], 1 }

</bundles_post_ra>
